<compile_context>
chip_gen: v7x
topology: tpu7x:2x2x1
jax: 0.10.0
libtpu: 0.0.40
codegen_flags: <defaults>
</compile_context>

<pallas_src>
import jax
import jax.numpy as jnp
from jax.experimental import pallas as pl
from jax.experimental.pallas import tpu as pltpu

_LANE = 128


def bert_concat_kernel(w_ref, x_ref, o_ref):
    # w_ref: (L,) f32 in SMEM   (bias already folded into the weights)
    # x_ref: (L, TN, 128) input dtype in VMEM
    # o_ref: (TN, 128) f32 in VMEM
    n_layers = x_ref.shape[0]

    # pass 1: running max across layers (numerically-safe softmax)
    m = x_ref[0].astype(jnp.float32)
    for l in range(1, n_layers):
        m = jnp.maximum(m, x_ref[l].astype(jnp.float32))

    # pass 2: weighted numerator and denominator (no per-layer divide)
    num = jnp.zeros_like(m)
    den = jnp.zeros_like(m)
    for l in range(n_layers):
        e = jnp.exp(x_ref[l].astype(jnp.float32) - m)    # EUP
        num = num + w_ref[l] * e                         # scalar * vector
        den = den + e

    o_ref[...] = (num * pl.reciprocal(den, approx=True)).astype(o_ref.dtype)


def _round_up(a, b):
    return (a + b - 1) // b * b


def _vmem_capacity_bytes():
    try:
        cap = getattr(pltpu.get_tpu_info(), "vmem_capacity_bytes", None)
        if cap:
            return int(cap)
    except Exception:
        pass
    return 64 << 20  # conservative default (v7x per-core VMEM)


def bert_concat(x, weights, bias, *, tile_n=None):
    """x: [L, B, T, F] (f32 or bf16) -> [B, T, F, 1] float32."""
    L, B, T, F = x.shape
    total = B * T * F
    n0 = pl.cdiv(total, _LANE)                 # lane-dense rows
    itemsize = jnp.dtype(x.dtype).itemsize
    sub = max(8, 32 // itemsize)               # sublane packing: f32->8, bf16->16

    # --- generation-aware VMEM limit / budget -----------------------------
    vmem_cap = _vmem_capacity_bytes()
    vmem_limit = min(int(vmem_cap * 7 // 8), 100 << 20)   # ~56 MiB v7x, ~100 MiB v5e/v6e

    if tile_n is None:
        per_row = (2 * L * _LANE * itemsize    # double-buffered input slab
                   + 2 * _LANE * 4             # double-buffered f32 output slab
                   + 6 * _LANE * 4)            # live f32 intermediates in the L-loop
        tile_n = max(sub, int((vmem_limit * 7 // 10) // per_row))
    tile_n = max(sub, (tile_n // sub) * sub)

    # keep >= 4 grid steps on large problems: >= 2 tiles per v7x TensorCore so
    # the per-core DMA pipeline stays double-buffered (neutral on v5e/v6e).
    min_steps = 4
    if n0 >= min_steps * 256:
        tile_n = min(tile_n, _round_up(pl.cdiv(n0, min_steps), sub))

    if tile_n >= n0:
        tile_n = n0          # single full block (legal even if n0 % sub != 0)
    grid = pl.cdiv(n0, tile_n)

    # --- lane-dense view; pad only to the next 128-lane boundary ----------
    x_flat = x.reshape(L, total)
    pad = n0 * _LANE - total
    if pad:
        x_flat = jnp.pad(x_flat, ((0, 0), (0, pad)))
    x_lanes = x_flat.reshape(L, n0, _LANE)

    # fold bias into the weights on the host (exact): one fewer in-kernel mul
    w = weights.astype(jnp.float32) * bias.astype(jnp.float32)[0]   # (L,)

    out = pl.pallas_call(
        bert_concat_kernel,
        out_shape=jax.ShapeDtypeStruct((n0, _LANE), jnp.float32),
        grid=(grid,),
        in_specs=[
            pl.BlockSpec(memory_space=pltpu.MemorySpace.SMEM),        # weights (L,)
            pl.BlockSpec((L, tile_n, _LANE), lambda i: (0, i, 0)),    # x tile
        ],
        out_specs=pl.BlockSpec((tile_n, _LANE), lambda i: (i, 0)),
        compiler_params=pltpu.CompilerParams(
            dimension_semantics=("parallel",),
            vmem_limit_bytes=vmem_limit,
        ),
    )(w, x_lanes)

    out_flat = out.reshape(-1)
    if pad:
        out_flat = out_flat[:total]
    return out_flat.reshape(B, T, F, 1)


def bert_concat_ref(x, weights, bias):
    # pure-JAX reference mirroring the PyTorch forward exactly
    xp = jnp.transpose(x, (1, 2, 3, 0))               # [B, T, F, L]
    xp = jax.nn.softmax(xp, axis=-1)
    return jnp.sum(xp * weights, axis=-1, keepdims=True) * bias


if __name__ == "__main__":
    L, B, T, F = 4, 2, 8, 32

    key = jax.random.PRNGKey(0)
    k_x, k_w = jax.random.split(key)

    x = jax.random.normal(k_x, (L, B, T, F), dtype=jnp.float32)
    # Module __init__: weights ~ N(0, 0.1), bias = ones(1)
    weights = 0.1 * jax.random.normal(k_w, (L,), dtype=jnp.float32)
    bias = jnp.ones((1,), dtype=jnp.float32)

    out = jax.block_until_ready(bert_concat(x, weights, bias))
    ref = bert_concat_ref(x, weights, bias)

    assert out.shape == (B, T, F, 1), out.shape
    # tolerance accounts for the approximate EUP reciprocal (~2^-12 rel. error)
    err = float(jnp.max(jnp.abs(out - ref)))
    assert err < 1e-3, err

    print("KERNEL_OK")
</pallas_src>

<mosaic_0001>
module attributes {stable_mosaic.version = 11 : i64} {
  func.func @bert_concat_kernel(%arg0: i32, %arg1: memref<4xf32, #tpu.memory_space<smem>>, %arg2: memref<4x4x128xf32, #tpu.memory_space<vmem>>, %arg3: memref<4x128xf32, #tpu.memory_space<vmem>>) attributes {dimension_semantics = [#tpu.dimension_semantics<parallel>], iteration_bounds = array<i64: 1>, scalar_prefetch = 0 : i64, scratch_operands = 0 : i64, tpu.core_type = #tpu.core_type<tc>, window_params = [{transform_indices = @transform_0, window_bounds = array<i64: 4>}, {transform_indices = @transform_1, window_bounds = array<i64: 4, 4, 128>}, {transform_indices = @transform_2, window_bounds = array<i64: 4, 128>}]} {
    %c0 = arith.constant 0 : index
    %c0_0 = arith.constant 0 : index
    %c0_1 = arith.constant 0 : index
    %0 = vector.load %arg2[%c0, %c0_0, %c0_1] : memref<4x4x128xf32, #tpu.memory_space<vmem>>, vector<1x4x128xf32>
    %1 = vector.shape_cast %0 : vector<1x4x128xf32> to vector<4x128xf32>
    %c1 = arith.constant 1 : index
    %c0_2 = arith.constant 0 : index
    %c0_3 = arith.constant 0 : index
    %2 = vector.load %arg2[%c1, %c0_2, %c0_3] : memref<4x4x128xf32, #tpu.memory_space<vmem>>, vector<1x4x128xf32>
    %3 = vector.shape_cast %2 : vector<1x4x128xf32> to vector<4x128xf32>
    %4 = arith.maximumf %1, %3 : vector<4x128xf32>
    %c2 = arith.constant 2 : index
    %c0_4 = arith.constant 0 : index
    %c0_5 = arith.constant 0 : index
    %5 = vector.load %arg2[%c2, %c0_4, %c0_5] : memref<4x4x128xf32, #tpu.memory_space<vmem>>, vector<1x4x128xf32>
    %6 = vector.shape_cast %5 : vector<1x4x128xf32> to vector<4x128xf32>
    %7 = arith.maximumf %4, %6 : vector<4x128xf32>
    %c3 = arith.constant 3 : index
    %c0_6 = arith.constant 0 : index
    %c0_7 = arith.constant 0 : index
    %8 = vector.load %arg2[%c3, %c0_6, %c0_7] : memref<4x4x128xf32, #tpu.memory_space<vmem>>, vector<1x4x128xf32>
    %9 = vector.shape_cast %8 : vector<1x4x128xf32> to vector<4x128xf32>
    %10 = arith.maximumf %7, %9 : vector<4x128xf32>
    %cst = arith.constant 0.000000e+00 : f32
    %11 = vector.broadcast %cst : f32 to vector<4x128xf32>
    %cst_8 = arith.constant 0.000000e+00 : f32
    %12 = vector.broadcast %cst_8 : f32 to vector<4x128xf32>
    %c0_9 = arith.constant 0 : index
    %c0_10 = arith.constant 0 : index
    %c0_11 = arith.constant 0 : index
    %13 = vector.load %arg2[%c0_9, %c0_10, %c0_11] : memref<4x4x128xf32, #tpu.memory_space<vmem>>, vector<1x4x128xf32>
    %14 = vector.shape_cast %13 : vector<1x4x128xf32> to vector<4x128xf32>
    %15 = arith.subf %14, %10 : vector<4x128xf32>
    %16 = math.exp %15 : vector<4x128xf32>
    %c0_12 = arith.constant 0 : index
    %17 = memref.load %arg1[%c0_12] : memref<4xf32, #tpu.memory_space<smem>>
    %18 = vector.broadcast %17 : f32 to vector<4x128xf32>
    %19 = arith.mulf %18, %16 : vector<4x128xf32>
    %20 = arith.addf %11, %19 : vector<4x128xf32>
    %21 = arith.addf %12, %16 : vector<4x128xf32>
    %c1_13 = arith.constant 1 : index
    %c0_14 = arith.constant 0 : index
    %c0_15 = arith.constant 0 : index
    %22 = vector.load %arg2[%c1_13, %c0_14, %c0_15] : memref<4x4x128xf32, #tpu.memory_space<vmem>>, vector<1x4x128xf32>
    %23 = vector.shape_cast %22 : vector<1x4x128xf32> to vector<4x128xf32>
    %24 = arith.subf %23, %10 : vector<4x128xf32>
    %25 = math.exp %24 : vector<4x128xf32>
    %c1_16 = arith.constant 1 : index
    %26 = memref.load %arg1[%c1_16] : memref<4xf32, #tpu.memory_space<smem>>
    %27 = vector.broadcast %26 : f32 to vector<4x128xf32>
    %28 = arith.mulf %27, %25 : vector<4x128xf32>
    %29 = arith.addf %20, %28 : vector<4x128xf32>
    %30 = arith.addf %21, %25 : vector<4x128xf32>
    %c2_17 = arith.constant 2 : index
    %c0_18 = arith.constant 0 : index
    %c0_19 = arith.constant 0 : index
    %31 = vector.load %arg2[%c2_17, %c0_18, %c0_19] : memref<4x4x128xf32, #tpu.memory_space<vmem>>, vector<1x4x128xf32>
    %32 = vector.shape_cast %31 : vector<1x4x128xf32> to vector<4x128xf32>
    %33 = arith.subf %32, %10 : vector<4x128xf32>
    %34 = math.exp %33 : vector<4x128xf32>
    %c2_20 = arith.constant 2 : index
    %35 = memref.load %arg1[%c2_20] : memref<4xf32, #tpu.memory_space<smem>>
    %36 = vector.broadcast %35 : f32 to vector<4x128xf32>
    %37 = arith.mulf %36, %34 : vector<4x128xf32>
    %38 = arith.addf %29, %37 : vector<4x128xf32>
    %39 = arith.addf %30, %34 : vector<4x128xf32>
    %c3_21 = arith.constant 3 : index
    %c0_22 = arith.constant 0 : index
    %c0_23 = arith.constant 0 : index
    %40 = vector.load %arg2[%c3_21, %c0_22, %c0_23] : memref<4x4x128xf32, #tpu.memory_space<vmem>>, vector<1x4x128xf32>
    %41 = vector.shape_cast %40 : vector<1x4x128xf32> to vector<4x128xf32>
    %42 = arith.subf %41, %10 : vector<4x128xf32>
    %43 = math.exp %42 : vector<4x128xf32>
    %c3_24 = arith.constant 3 : index
    %44 = memref.load %arg1[%c3_24] : memref<4xf32, #tpu.memory_space<smem>>
    %45 = vector.broadcast %44 : f32 to vector<4x128xf32>
    %46 = arith.mulf %45, %43 : vector<4x128xf32>
    %47 = arith.addf %38, %46 : vector<4x128xf32>
    %48 = arith.addf %39, %43 : vector<4x128xf32>
    %49 = tpu.reciprocal %48 {approx = true} : vector<4x128xf32> -> vector<4x128xf32>
    %50 = arith.mulf %47, %49 : vector<4x128xf32>
    %c0_25 = arith.constant 0 : index
    %c0_26 = arith.constant 0 : index
    %51 = vector.load %arg3[%c0_25, %c0_26] : memref<4x128xf32, #tpu.memory_space<vmem>>, vector<4x128xf32>
    tpu.vector_store %arg3[%c0_25, %c0_26], %50 {strides = array<i32>} : memref<4x128xf32, #tpu.memory_space<vmem>>, vector<4x128xf32>,
    return
  }
  func.func @transform_0(%arg0: i32) -> i32 {
    %c0_i32 = arith.constant 0 : i32
    %c0_i32_0 = arith.constant 0 : i32
    return %c0_i32 : i32
  }
  func.func @transform_1(%arg0: i32) -> (i32, i32, i32) {
    %c0_i32 = arith.constant 0 : i32
    %c0_i32_0 = arith.constant 0 : i32
    %c0_i32_1 = arith.constant 0 : i32
    return %c0_i32, %arg0, %c0_i32_0 : i32, i32, i32
  }
  func.func @transform_2(%arg0: i32) -> (i32, i32) {
    %c0_i32 = arith.constant 0 : i32
    %c0_i32_0 = arith.constant 0 : i32
    return %arg0, %c0_i32 : i32, i32
  }
}

</mosaic_0001>

<bundles_post_ra>
// kernel: tpu_custom_call.1
= control target key start
LH: loop header
LB: loop body
LE: loop exit
PB: predicated region body
PF: predicated region fallthrough
CT: control target
= control target key end

     0   :  { %7 = vsyncpa [#allocation5], 0  ;;  %s232_s0 = inlined_call_operand.hbm [shape: f32[4], index: 0, kind: input, shape index: {}]   ;;  %s233_s1 = inlined_call_operand.hbm [shape: f32[4,4,128], index: 1, kind: input, shape index: {}]   ;;  %s234_s2 = inlined_call_operand.hbm [shape: f32[4,128], index: 2, kind: output, shape index: {}]  }
   0x1   :  { %8 = vsyncpa [#allocation3], 0 }
   0x2   :  { %9 = vsyncpa [#allocation4], 0  ;;  %s116_s11 = scalar_lea.hbm %s232_s0, 16 }
   0x3   :  { %p117_p0 = scmp.ne.s32.totalorder %s232_s0, %s116_s11  ;;  %p120_p1 = scmp.lt.u32.totalorder %s116_s11, %s232_s0 }
   0x5   :  { %p122_p2 = pnand %p120_p1, %p117_p0 }
   0x7   :  { %125 = shalt.err (!%p122_p2)
}
   0x8   :  { %s176_s16 = smov [#allocation2]   ;;  %s177_s19 = smov [#allocation6]  }
   0x9   :  { %17 = dma.hbm_to_smem %s232_s0, 16, %s176_s16, [#allocation5]  }
   0xa   :  { %s23_s20 = sshll.u32 %s177_s19, 4  ;;  %s126_s23 = scalar_lea.hbm %s233_s1, 256  ;;  %s24_s20 = int_to_ptr.vmem [resolvable:$true] %s23_s20 }
   0xb   :  { %p127_p3 = scmp.ne.s32.totalorder %s233_s1, %s126_s23  ;;  %p130_p4 = scmp.lt.u32.totalorder %s126_s23, %s233_s1 }
   0xd   :  { %p132_p5 = pnand %p130_p4, %p127_p3 }
   0xf   :  { %135 = shalt.err (!%p132_p5)
}
  0x10   :  { %s136_s28 = scalar_lea.vmem %s24_s20, 256  ;;  %p141_p7 = scmp.lt.s32.totalorder %s24_s20, %s24_s20 }
  0x11   :  { %p137_p6 = scmp.ne.s32.totalorder %s24_s20, %s136_s28  ;;  %p142_p8 = scmp.lt.s32.totalorder %s136_s28, %s136_s28 }
  0x13   :  { %p143_p9 = por %p142_p8, %p141_p7 }
  0x15   :  { %p144_p10 = pnand %p143_p9, %p137_p6 }
  0x17   :  { %147 = shalt.err (!%p144_p10)
}
  0x18   :  { %s178_s0 = smov 64   ;;  %s179_s29 = smov 4  }
  0x19   :  { %29 = dma.hbm_to_vmem [thread:$0]  %s233_s1, 256, %s24_s20, [#allocation3], %s178_s0, %s178_s0, %s179_s29  }
  0x1a   :  { %170 = dma.done.wait [#allocation5], 16  }
  0x1b   :  { %171 = vsyncadd [#allocation5], 4294967280 }
  0x1c   :  { %172 = dma.done.wait [#allocation3], 256  }
  0x1d   :  { %173 = vsyncadd [#allocation3], 4294967040 }
  0x1e   :  { %36 = sfence }
  0x1f   :  { %v37_v0 = vld [vmem:[#allocation6] sm:$0xf]  ;;  %v39_v1 = vld [vmem:[#allocation6 + $0x4] sm:$0xf]  ;;  %v42_v2 = vld [vmem:[#allocation6 + $0x8] sm:$0xf] }
  0x20   :  { %v40_v3 = vmax.f32 %v37_v0, %v39_v1  ;;  %v45_v4 = vld [vmem:[#allocation6 + $0xc] sm:$0xf]  ;;  %s50_s1 = sld [smem:[#allocation2]]  ;;  %s98_s4 = sld [smem:[#allocation2 + $0x1]] }
  0x21   :  { %s99_s5 = sld [smem:[#allocation2 + $0x2]]  ;;  %s100_s6 = sld [smem:[#allocation2 + $0x3]] }
  0x22   :  { %v43_v5 = vmax.f32 %v40_v3, %v42_v2  ;;  %s180_s7 = smov [#allocation7]  }
  0x23   :  { %s88_s8 = sshll.u32 %s180_s7, 4  ;;  %s89_s8 = int_to_ptr.vmem [resolvable:$true] %s88_s8 }
  0x24   :  { %v46_v6 = vmax.f32 %v43_v5, %v45_v4  ;;  %s148_s9 = scalar_lea.vmem %s89_s8, 64  ;;  %p153_p12 = scmp.lt.s32.totalorder %s89_s8, %s89_s8 }
  0x25   :  { %p149_p11 = scmp.ne.s32.totalorder %s89_s8, %s148_s9  ;;  %p154_p13 = scmp.lt.s32.totalorder %s148_s9, %s148_s9 }
  0x26   :  { %v47_v7 = vsub.f32 %v37_v0, %v46_v6  ;;  %v55_v8 = vsub.f32 %v39_v1, %v46_v6  ;;  %v63_v9 = vsub.f32 %v42_v2, %v46_v6  ;;  %v71_v10 = vsub.f32 %v45_v4, %v46_v6 }
  0x27   :  { %v51_v16 = vstv %s50_s1  ;;  %v59_v17 = vstv %s98_s4  ;;  %v67_v24 = vstv %s99_s5  ;;  %v75_v29 = vstv %s100_s6  ;;  %p155_p0 = por %p154_p13, %p153_p12 }
  0x28   :  { %v48_v11 = vmul.f32 1.442695, %v47_v7  ;;  %v56_v12 = vmul.f32 1.442695, %v55_v8  ;;  %v64_v13 = vmul.f32 1.442695, %v63_v9 }
  0x29   :  { %v72_v14 = vmul.f32 1.442695, %v71_v10  ;;  %p156_p1 = pnand %p155_p0, %p149_p11 }
  0x2a   :  { %106 = vpow2.f32 %v48_v11 }
  0x2b   :  { %108 = vpow2.f32 %v56_v12 }
  0x2c   :  { %110 = vpow2.f32 %v64_v13 }
  0x2d   :  { %112 = vpow2.f32 %v72_v14 }
  0x34   :  { %v107_v15 = vpop.eup %106 }
  0x35   :  { %v109_v18 = vpop.eup %108  ;;  %v52_v22 = vmul.f32 %v107_v15, %v51_v16 }
  0x36   :  { %v111_v19 = vpop.eup %110  ;;  %v62_v20 = vadd.f32 %v109_v18, %v107_v15  ;;  %v60_v23 = vmul.f32 %v109_v18, %v59_v17 }
  0x37   :  { %v113_v21 = vpop.eup %112  ;;  %v68_v28 = vmul.f32 %v111_v19, %v67_v24 }
  0x38   :  { %v70_v25 = vadd.f32 %v111_v19, %v62_v20  ;;  %v61_v27 = vadd.f32 %v60_v23, %v52_v22  ;;  %v76_v31 = vmul.f32 %v113_v21, %v75_v29 }
  0x3a   :  { %v78_v26 = vadd.f32 %v113_v21, %v70_v25  ;;  %v69_v30 = vadd.f32 %v68_v28, %v61_v27 }
  0x3c   :  { %114 = vrcp.f32 %v78_v26  ;;  %v77_v32 = vadd.f32 %v76_v31, %v69_v30 }
  0x46   :  { %v115_v33 = vpop.eup %114 }
  0x47   :  { %v80_v34 = vmul.f32 %v115_v33, %v77_v32 }
  0x49   :  { %81 = vst [vmem:[#allocation7] sm:$0xf] %v80_v34 }
  0x4a   :  { %159 = shalt.err (!%p156_p1)
}
  0x4b   :  { %s160_s12 = scalar_lea.hbm %s234_s2, 64 }
  0x4c   :  { %p161_p2 = scmp.ne.s32.totalorder %s234_s2, %s160_s12  ;;  %p164_p3 = scmp.lt.u32.totalorder %s160_s12, %s234_s2 }
  0x4e   :  { %p166_p4 = pnand %p164_p3, %p161_p2 }
  0x50   :  { %169 = shalt.err (!%p166_p4)
}
  0x51   :  { %91 = dma.vmem_to_hbm [thread:$0]  %s89_s8, 64, %s234_s2, [#allocation4]  }
  0x52   :  { %174 = dma.done.wait [#allocation4], 64  }
  0x53   :  { %175 = vsyncadd [#allocation4], 4294967232 }
  0x54   :  { %95 = vsyncpa [#allocation3], 1 }
  0x55   :  { %96 = vsyncpa [#allocation4], 1 }
  0x56   :  { %97 = vsyncpa [#allocation5], 1 }

</bundles_post_ra>
